<compile_context>
chip_gen: v7x
topology: tpu7x:2x2x1
jax: 0.10.0
libtpu: 0.0.40
codegen_flags: <defaults>
</compile_context>

<pallas_src>
import jax
import jax.numpy as jnp
from jax.experimental import pallas as pl
from jax.experimental.pallas import tpu as pltpu

HIDDEN = 100      # true hidden width (matches the PyTorch module)
HPAD = 128        # lane-aligned hidden width used inside the kernel


def _round_up(n, m):
    return ((n + m - 1) // m) * m


def critic_kernel(x_ref, w1_ref, b1_ref, w2_ref, b2_ref, w3_ref, b3_ref, o_ref):
    # x_ref: (TM, in_dim) bf16; w1: (in_dim, 128) bf16; w2: (128, 128) bf16
    # b1/b2: (1, 128) f32; w3: (1, 128) f32 row; b3: (1, 1) f32; o: (TM, 1) f32
    x = x_ref[...]

    # fc1 on the MXU (bf16 inputs, f32 accumulation), bias + ReLU on the VPU.
    h1 = jnp.dot(x, w1_ref[...], preferred_element_type=jnp.float32) + b1_ref[...]
    h1 = jnp.maximum(h1, 0.0)

    # fc2 on the MXU; re-quantize the activation to bf16 to keep the MXU bf16-fed.
    h2 = jnp.dot(h1.astype(jnp.bfloat16), w2_ref[...],
                 preferred_element_type=jnp.float32) + b2_ref[...]
    h2 = jnp.maximum(h2, 0.0)

    # fc3 (out_features == 1) on VPU + XLU instead of a 1-column MXU matmul:
    # padded lanes of w3 are zero, so the lane reduction matches h2[:, :100] @ w3.
    out = jnp.sum(h2 * w3_ref[...], axis=-1, keepdims=True) + b3_ref[...]
    o_ref[...] = out.astype(o_ref.dtype)


def critic_forward(x, packed, *, tm=1024):
    """x: [B, obs_dim + act_dim] float32. packed: output of pack_params().
    Returns [B, 1] float32."""
    B, in_dim = x.shape
    assert packed["w1"].shape[0] == in_dim
    hpad = packed["w2"].shape[0]

    # Pick the batch tile: multiple of 16 (bf16 sublane packing), capped so tiny
    # batches don't get over-padded.  Sweep 512-2048 for large RL batches.
    tm = min(tm, _round_up(B, 16))
    tm = _round_up(max(tm, 16), 16)
    b_pad = _round_up(B, tm)
    n_tiles = b_pad // tm

    # Cast x to bf16 (halves HBM traffic of the dominant operand) and zero-pad
    # the batch to a whole number of tiles; padded rows are sliced off below.
    x_p = jnp.pad(x.astype(jnp.bfloat16), ((0, b_pad - B), (0, 0)))

    grid_spec = pltpu.PrefetchScalarGridSpec(
        num_scalar_prefetch=0,
        grid=(n_tiles,),
        in_specs=[
            pl.BlockSpec((tm, in_dim), lambda i: (i, 0)),     # x: tiled over batch
            pl.BlockSpec((in_dim, hpad), lambda i: (0, 0)),   # w1: VMEM-resident
            pl.BlockSpec((1, hpad), lambda i: (0, 0)),        # b1
            pl.BlockSpec((hpad, hpad), lambda i: (0, 0)),     # w2
            pl.BlockSpec((1, hpad), lambda i: (0, 0)),        # b2
            pl.BlockSpec((1, hpad), lambda i: (0, 0)),        # w3 row
            pl.BlockSpec((1, 1), lambda i: (0, 0)),           # b3
        ],
        out_specs=pl.BlockSpec((tm, 1), lambda i: (i, 0)),
    )

    cost = pl.CostEstimate(
        flops=2 * b_pad * (in_dim * hpad + hpad * hpad + hpad),
        transcendentals=0,
        bytes_accessed=(x_p.size * 2 + b_pad * 4          # x in, out
                        + in_dim * hpad * 2 + hpad * hpad * 2  # bf16 weights
                        + 3 * hpad * 4 + 4),               # f32 biases + w3 row
    )

    out = pl.pallas_call(
        critic_kernel,
        out_shape=jax.ShapeDtypeStruct((b_pad, 1), jnp.float32),
        grid_spec=grid_spec,
        compiler_params=pltpu.CompilerParams(
            dimension_semantics=("parallel",),   # batch axis -> both v7x TCs
        ),
        cost_estimate=cost,
    )(x_p, packed["w1"], packed["b1"], packed["w2"], packed["b2"],
      packed["w3"], packed["b3"])

    return out[:B]


def init_params(key, obs_dim, act_dim, hidden=HIDDEN):
    """PyTorch-default Linear init: U(-1/sqrt(fan_in), 1/sqrt(fan_in)).
    Weights stored (in_features, out_features); true (unpadded) shapes, f32."""
    in_dim = obs_dim + act_dim
    k1, k2, k3, k4, k5, k6 = jax.random.split(key, 6)

    def lin_init(kw, kb, fan_in, fan_out):
        bound = 1.0 / jnp.sqrt(jnp.float32(fan_in))
        w = jax.random.uniform(kw, (fan_in, fan_out), jnp.float32, -bound, bound)
        b = jax.random.uniform(kb, (fan_out,), jnp.float32, -bound, bound)
        return w, b

    w1, b1 = lin_init(k1, k2, in_dim, hidden)
    w2, b2 = lin_init(k3, k4, hidden, hidden)
    w3, b3 = lin_init(k5, k6, hidden, 1)
    return {"w1": w1, "b1": b1, "w2": w2, "b2": b2, "w3": w3, "b3": b3}


def pack_params(p, hpad=HPAD):
    """Zero-pad hidden 100 -> 128, cast matmul weights to bf16 (MXU-native),
    keep biases and the fc3 row in f32 (VPU math).  Padding preserves semantics:
    padded activations are exactly 0 after bias=0 + ReLU and padded w3 lanes are 0."""
    in_dim, hidden = p["w1"].shape
    w1 = jnp.zeros((in_dim, hpad), jnp.float32).at[:, :hidden].set(p["w1"])
    w2 = jnp.zeros((hpad, hpad), jnp.float32).at[:hidden, :hidden].set(p["w2"])
    b1 = jnp.zeros((1, hpad), jnp.float32).at[0, :hidden].set(p["b1"])
    b2 = jnp.zeros((1, hpad), jnp.float32).at[0, :hidden].set(p["b2"])
    w3 = jnp.zeros((1, hpad), jnp.float32).at[0, :hidden].set(p["w3"][:, 0])
    b3 = p["b3"].reshape(1, 1).astype(jnp.float32)
    return {
        "w1": w1.astype(jnp.bfloat16), "b1": b1,
        "w2": w2.astype(jnp.bfloat16), "b2": b2,
        "w3": w3, "b3": b3,
    }


def critic_ref(x, p):
    """Pure-JAX f32 reference (mirrors the PyTorch module exactly)."""
    h1 = jnp.maximum(x @ p["w1"] + p["b1"], 0.0)
    h2 = jnp.maximum(h1 @ p["w2"] + p["b2"], 0.0)
    return h2 @ p["w3"] + p["b3"]


def critic_ref_packed(x, pk):
    """Reference that mirrors the kernel's bf16 quantization points exactly."""
    xb = x.astype(jnp.bfloat16).astype(jnp.float32)
    h1 = jnp.maximum(xb @ pk["w1"].astype(jnp.float32) + pk["b1"], 0.0)
    h1 = h1.astype(jnp.bfloat16).astype(jnp.float32)
    h2 = jnp.maximum(h1 @ pk["w2"].astype(jnp.float32) + pk["b2"], 0.0)
    return jnp.sum(h2 * pk["w3"], axis=-1, keepdims=True) + pk["b3"]


if __name__ == "__main__":
    key = jax.random.PRNGKey(0)
    obs_dim, act_dim, batch = 16, 8, 8

    kp, kx, kx2 = jax.random.split(key, 3)
    params = init_params(kp, obs_dim, act_dim)
    packed = pack_params(params)

    # Small-batch path (single grid step).
    x = jax.random.normal(kx, (batch, obs_dim + act_dim), jnp.float32)
    out = jax.block_until_ready(critic_forward(x, packed))
    assert out.shape == (batch, 1)
    assert jnp.allclose(out, critic_ref_packed(x, packed), atol=5e-3, rtol=5e-3)
    assert jnp.allclose(out, critic_ref(x, params), atol=1e-1, rtol=1e-1)

    # Multi-tile path: exercises the batch grid, resident weights and batch padding.
    x2 = jax.random.normal(kx2, (40, obs_dim + act_dim), jnp.float32)
    out2 = jax.block_until_ready(critic_forward(x2, packed, tm=16))
    assert out2.shape == (40, 1)
    assert jnp.allclose(out2, critic_ref_packed(x2, packed), atol=5e-3, rtol=5e-3)

    print("KERNEL_OK")
</pallas_src>

<mosaic_0001>
module attributes {stable_mosaic.version = 11 : i64} {
  func.func @critic_kernel(%arg0: i32, %arg1: memref<16x24xbf16, #tpu.memory_space<vmem>>, %arg2: memref<24x128xbf16, #tpu.memory_space<vmem>>, %arg3: memref<1x128xf32, #tpu.memory_space<vmem>>, %arg4: memref<128x128xbf16, #tpu.memory_space<vmem>>, %arg5: memref<1x128xf32, #tpu.memory_space<vmem>>, %arg6: memref<1x128xf32, #tpu.memory_space<vmem>>, %arg7: memref<1x1xf32, #tpu.memory_space<vmem>>, %arg8: memref<16x1xf32, #tpu.memory_space<vmem>>) attributes {dimension_semantics = [#tpu.dimension_semantics<parallel>], iteration_bounds = array<i64: 1>, scalar_prefetch = 0 : i64, scratch_operands = 0 : i64, tpu.core_type = #tpu.core_type<tc>, window_params = [{transform_indices = @transform_0, window_bounds = array<i64: 16, 24>}, {pipeline_mode = #tpu.pipeline_mode<synchronous>, transform_indices = @transform_1, window_bounds = array<i64: 24, 128>}, {pipeline_mode = #tpu.pipeline_mode<synchronous>, transform_indices = @transform_2, window_bounds = array<i64: 1, 128>}, {pipeline_mode = #tpu.pipeline_mode<synchronous>, transform_indices = @transform_3, window_bounds = array<i64: 128, 128>}, {pipeline_mode = #tpu.pipeline_mode<synchronous>, transform_indices = @transform_4, window_bounds = array<i64: 1, 128>}, {pipeline_mode = #tpu.pipeline_mode<synchronous>, transform_indices = @transform_5, window_bounds = array<i64: 1, 128>}, {pipeline_mode = #tpu.pipeline_mode<synchronous>, transform_indices = @transform_6, window_bounds = array<i64: 1, 1>}, {transform_indices = @transform_7, window_bounds = array<i64: 16, 1>}]} {
    %c0 = arith.constant 0 : index
    %c0_0 = arith.constant 0 : index
    %0 = vector.load %arg1[%c0, %c0_0] : memref<16x24xbf16, #tpu.memory_space<vmem>>, vector<16x24xbf16>
    %c0_1 = arith.constant 0 : index
    %c0_2 = arith.constant 0 : index
    %1 = vector.load %arg2[%c0_1, %c0_2] : memref<24x128xbf16, #tpu.memory_space<vmem>>, vector<24x128xbf16>
    %cst = arith.constant dense<0.000000e+00> : vector<16x128xf32>
    %2 = tpu.matmul %0, %1, %cst {dimension_numbers = #tpu.dot_dimension_numbers<[1], [0], [0], [1], [0, 0, 1, 1], [], []>} : vector<16x24xbf16>, vector<24x128xbf16>, vector<16x128xf32> -> vector<16x128xf32>
    %c0_3 = arith.constant 0 : index
    %c0_4 = arith.constant 0 : index
    %3 = vector.load %arg3[%c0_3, %c0_4] : memref<1x128xf32, #tpu.memory_space<vmem>>, vector<1x128xf32>
    %4 = vector.broadcast %3 : vector<1x128xf32> to vector<16x128xf32>
    %5 = arith.addf %2, %4 : vector<16x128xf32>
    %cst_5 = arith.constant 0.000000e+00 : f32
    %6 = vector.broadcast %cst_5 : f32 to vector<16x128xf32>
    %7 = arith.maximumf %5, %6 : vector<16x128xf32>
    %8 = arith.truncf %7 : vector<16x128xf32> to vector<16x128xbf16>
    %c0_6 = arith.constant 0 : index
    %c0_7 = arith.constant 0 : index
    %9 = vector.load %arg4[%c0_6, %c0_7] : memref<128x128xbf16, #tpu.memory_space<vmem>>, vector<128x128xbf16>
    %cst_8 = arith.constant dense<0.000000e+00> : vector<16x128xf32>
    %10 = tpu.matmul %8, %9, %cst_8 {dimension_numbers = #tpu.dot_dimension_numbers<[1], [0], [0], [1], [0, 0, 1, 1], [], []>} : vector<16x128xbf16>, vector<128x128xbf16>, vector<16x128xf32> -> vector<16x128xf32>
    %c0_9 = arith.constant 0 : index
    %c0_10 = arith.constant 0 : index
    %11 = vector.load %arg5[%c0_9, %c0_10] : memref<1x128xf32, #tpu.memory_space<vmem>>, vector<1x128xf32>
    %12 = vector.broadcast %11 : vector<1x128xf32> to vector<16x128xf32>
    %13 = arith.addf %10, %12 : vector<16x128xf32>
    %cst_11 = arith.constant 0.000000e+00 : f32
    %14 = vector.broadcast %cst_11 : f32 to vector<16x128xf32>
    %15 = arith.maximumf %13, %14 : vector<16x128xf32>
    %c0_12 = arith.constant 0 : index
    %c0_13 = arith.constant 0 : index
    %16 = vector.load %arg6[%c0_12, %c0_13] : memref<1x128xf32, #tpu.memory_space<vmem>>, vector<1x128xf32>
    %17 = vector.broadcast %16 : vector<1x128xf32> to vector<16x128xf32>
    %18 = arith.mulf %15, %17 : vector<16x128xf32>
    %cst_14 = arith.constant dense<0.000000e+00> : vector<16xf32>
    %19 = vector.multi_reduction <add>, %18, %cst_14 [1] : vector<16x128xf32> to vector<16xf32>
    %20 = vector.shape_cast %19 : vector<16xf32> to vector<16x1xf32>
    %c0_15 = arith.constant 0 : index
    %c0_16 = arith.constant 0 : index
    %21 = vector.load %arg7[%c0_15, %c0_16] : memref<1x1xf32, #tpu.memory_space<vmem>>, vector<1x1xf32>
    %22 = vector.broadcast %21 : vector<1x1xf32> to vector<16x1xf32>
    %23 = arith.addf %20, %22 : vector<16x1xf32>
    %c0_17 = arith.constant 0 : index
    %c0_18 = arith.constant 0 : index
    %24 = vector.load %arg8[%c0_17, %c0_18] : memref<16x1xf32, #tpu.memory_space<vmem>>, vector<16x1xf32>
    tpu.vector_store %arg8[%c0_17, %c0_18], %23 {strides = array<i32>} : memref<16x1xf32, #tpu.memory_space<vmem>>, vector<16x1xf32>,
    return
  }
  func.func @transform_0(%arg0: i32) -> (i32, i32) {
    %c0_i32 = arith.constant 0 : i32
    %c0_i32_0 = arith.constant 0 : i32
    return %arg0, %c0_i32 : i32, i32
  }
  func.func @transform_1(%arg0: i32) -> (i32, i32) {
    %c0_i32 = arith.constant 0 : i32
    %c0_i32_0 = arith.constant 0 : i32
    %c0_i32_1 = arith.constant 0 : i32
    return %c0_i32, %c0_i32_0 : i32, i32
  }
  func.func @transform_2(%arg0: i32) -> (i32, i32) {
    %c0_i32 = arith.constant 0 : i32
    %c0_i32_0 = arith.constant 0 : i32
    %c0_i32_1 = arith.constant 0 : i32
    return %c0_i32, %c0_i32_0 : i32, i32
  }
  func.func @transform_3(%arg0: i32) -> (i32, i32) {
    %c0_i32 = arith.constant 0 : i32
    %c0_i32_0 = arith.constant 0 : i32
    %c0_i32_1 = arith.constant 0 : i32
    return %c0_i32, %c0_i32_0 : i32, i32
  }
  func.func @transform_4(%arg0: i32) -> (i32, i32) {
    %c0_i32 = arith.constant 0 : i32
    %c0_i32_0 = arith.constant 0 : i32
    %c0_i32_1 = arith.constant 0 : i32
    return %c0_i32, %c0_i32_0 : i32, i32
  }
  func.func @transform_5(%arg0: i32) -> (i32, i32) {
    %c0_i32 = arith.constant 0 : i32
    %c0_i32_0 = arith.constant 0 : i32
    %c0_i32_1 = arith.constant 0 : i32
    return %c0_i32, %c0_i32_0 : i32, i32
  }
  func.func @transform_6(%arg0: i32) -> (i32, i32) {
    %c0_i32 = arith.constant 0 : i32
    %c0_i32_0 = arith.constant 0 : i32
    %c0_i32_1 = arith.constant 0 : i32
    return %c0_i32, %c0_i32_0 : i32, i32
  }
  func.func @transform_7(%arg0: i32) -> (i32, i32) {
    %c0_i32 = arith.constant 0 : i32
    %c0_i32_0 = arith.constant 0 : i32
    return %arg0, %c0_i32 : i32, i32
  }
}

</mosaic_0001>

<bundles_post_ra>
// kernel: tpu_custom_call.1
= control target key start
LH: loop header
LB: loop body
LE: loop exit
PB: predicated region body
PF: predicated region fallthrough
CT: control target
= control target key end

     0   :  { %s554_s0 = inlined_call_operand.hbm [shape: bf16[16,24], index: 0, kind: input, shape index: {}]   ;;  %s555_s1 = inlined_call_operand.hbm [shape: bf16[24,128], index: 1, kind: input, shape index: {}]   ;;  %s556_s2 = inlined_call_operand.vmem [shape: f32[1,128], index: 2, kind: input, shape index: {}]   ;;  %s557_s3 = inlined_call_operand.hbm [shape: bf16[128,128], index: 3, kind: input, shape index: {}]   ;;  %s558_s4 = inlined_call_operand.vmem [shape: f32[1,128], index: 4, kind: input, shape index: {}]   ;;  %s559_s5 = inlined_call_operand.vmem [shape: f32[1,128], index: 5, kind: input, shape index: {}]   ;;  %s560_s6 = inlined_call_operand.<no memory space> [shape: f32[1,1], index: 6, kind: input, shape index: {}]   ;;  %s561_s7 = inlined_call_operand.vmem [shape: f32[16,1], index: 7, kind: output, shape index: {}]  }
   0x1   :  { %v12_v0 = vstv %s560_s6 }
   0x2   :  { %13 = vst [vmem:[#allocation2] sm:$0x1] %v12_v0 }
   0x3   :  { %14 = vsyncpa [#allocation4], 0 }
   0x4   :  { %15 = vsyncpa [#allocation6], 0  ;;  %s437_s26 = smov [#allocation5]   ;;  %s438_s28 = smov [#allocation3]  }
   0x5   :  { %s33_s27 = sshll.u32 %s437_s26, 4  ;;  %s21_s29 = sshll.u32 %s438_s28, 4  ;;  %s34_s27 = int_to_ptr.vmem [resolvable:$true] %s33_s27  ;;  %s487_s29 = int_to_ptr.vmem [resolvable:$true] %s21_s29 }
   0x6   :  { %s367_s9 = scalar_lea.hbm %s555_s1, 192 }
   0x7   :  { %p368_p0 = scmp.ne.s32.totalorder %s555_s1, %s367_s9  ;;  %p371_p1 = scmp.lt.u32.totalorder %s367_s9, %s555_s1 }
   0x9   :  { %p373_p2 = pnand %p371_p1, %p368_p0 }
   0xb   :  { %376 = shalt.err (!%p373_p2)
}
   0xc   :  { %s377_s13 = scalar_lea.vmem %s34_s27, 192  ;;  %p382_p4 = scmp.lt.s32.totalorder %s34_s27, %s34_s27 }
   0xd   :  { %p378_p3 = scmp.ne.s32.totalorder %s34_s27, %s377_s13  ;;  %p383_p5 = scmp.lt.s32.totalorder %s377_s13, %s377_s13 }
   0xf   :  { %p384_p6 = por %p383_p5, %p382_p4 }
  0x11   :  { %p385_p7 = pnand %p384_p6, %p378_p3 }
  0x13   :  { %388 = shalt.err (!%p385_p7)
}
  0x14   :  { %s439_s14 = smov 64   ;;  %s440_s15 = smov 4  }
  0x15   :  { %39 = dma.hbm_to_vmem [thread:$0]  %s555_s1, 192, %s34_s27, [#allocation6], %s439_s14, %s439_s14, %s440_s15  }
  0x16   :  { %s389_s20 = scalar_lea.hbm %s554_s0, 128 }
  0x17   :  { %p390_p8 = scmp.ne.s32.totalorder %s554_s0, %s389_s20  ;;  %p393_p9 = scmp.lt.u32.totalorder %s389_s20, %s554_s0 }
  0x19   :  { %p395_p10 = pnand %p393_p9, %p390_p8 }
  0x1b   :  { %398 = shalt.err (!%p395_p10)
}
  0x1c   :  { %s399_s25 = scalar_lea.vmem %s487_s29, 128  ;;  %p404_p12 = scmp.lt.s32.totalorder %s487_s29, %s487_s29 }
  0x1d   :  { %p400_p11 = scmp.ne.s32.totalorder %s487_s29, %s399_s25  ;;  %p405_p13 = scmp.lt.s32.totalorder %s399_s25, %s399_s25 }
  0x1f   :  { %p406_p0 = por %p405_p13, %p404_p12 }
  0x21   :  { %p407_p1 = pnand %p406_p0, %p400_p11 }
  0x23   :  { %410 = shalt.err (!%p407_p1)
}
  0x24   :  { %27 = dma.hbm_to_vmem [thread:$0]  %s554_s0, 128, %s487_s29, [#allocation4], %s439_s14, %s439_s14, %s440_s15  }
  0x25   :  { %s441_s27 = smov [#allocation7]   ;;  %s411_s9 = scalar_lea.hbm %s557_s3, 1024 }
  0x26   :  { %s47_s28 = sshll.u32 %s441_s27, 4  ;;  %p412_p2 = scmp.ne.s32.totalorder %s557_s3, %s411_s9  ;;  %s48_s28 = int_to_ptr.vmem [resolvable:$true] %s47_s28 }
  0x27   :  { %p415_p3 = scmp.lt.u32.totalorder %s411_s9, %s557_s3 }
  0x29   :  { %p417_p4 = pnand %p415_p3, %p412_p2 }
  0x2b   :  { %420 = shalt.err (!%p417_p4)
}
  0x2c   :  { %s421_s13 = scalar_lea.vmem %s48_s28, 1024  ;;  %p426_p6 = scmp.lt.s32.totalorder %s48_s28, %s48_s28 }
  0x2d   :  { %p422_p5 = scmp.ne.s32.totalorder %s48_s28, %s421_s13  ;;  %p427_p7 = scmp.lt.s32.totalorder %s421_s13, %s421_s13 }
  0x2f   :  { %p428_p8 = por %p427_p7, %p426_p6 }
  0x31   :  { %p429_p9 = pnand %p428_p8, %p422_p5 }
  0x33   :  { %432 = shalt.err (!%p429_p9)
}
  0x34   :  { %53 = dma.hbm_to_vmem [thread:$0]  %s557_s3, 1024, %s48_s28, [#allocation6], %s439_s14, %s439_s14, %s440_s15  }
  0x35   :  { %433 = dma.done.wait [#allocation4], 128  }
  0x36   :  { %434 = vsyncadd [#allocation4], 4294967168 }
  0x37   :  { %435 = dma.done.wait [#allocation6], 1216  }
  0x38   :  { %436 = vsyncadd [#allocation6], 4294966080  ;;  %v442_v1 = vmov 0.0   ;;  %vm443_vm0 = vmmov 0   ;;  %v356_v2 = vld [vmem:[#allocation5] sm:$0xff]   ;;  %vm100_vm1 = vcmask 1043456  }
  0x39   :  { %321 = vmatprep.subr.bf16.mxu0 %v442_v1  ;;  %325 = vmatprep.mubr.msk.bf16.mxu0 %vm443_vm0, %v442_v1  ;;  %v357_v3 = vld [vmem:[#allocation5 + $0x8] ss:$0 sps:$4 sm:$0xff]   ;;  %v359_v5 = vld [vmem:[#allocation7] sm:$0xff]   ;;  %v358_v6 = vld [vmem:[#allocation3] sm:$0xff]   ;;  %vm96_vm2 = vcmask 195584   ;;  %vm284_vm3 = vcmask 7168  }
  0x3a   :  { %329 = vmatprep.subr.bf16.mxu1 %v442_v1  ;;  %345 = vmatprep.mubr.msk.bf16.mxu1 %vm443_vm0, %v442_v1  ;;  %v102_v4 = vsel %vm100_vm1, %v357_v3, 0  ;;  %v360_v7 = vld [vmem:[#allocation7 + $0x8] sm:$0xff]   ;;  %v361_v8 = vld [vmem:[#allocation7 + $0x10] sm:$0xff]   ;;  %v362_v9 = vld [vmem:[#allocation7 + $0x18] sm:$0xff]  }
  0x3b   :  { %322 = vmatpush3.bf16.msra.mxu0 %v356_v2  ;;  %330 = vmatpush3.bf16.msra.mxu1 %v359_v5  ;;  %v363_v10 = vld [vmem:[#allocation7 + $0x20] sm:$0xff]   ;;  %v364_v11 = vld [vmem:[#allocation7 + $0x28] sm:$0xff]   ;;  %v365_v12 = vld [vmem:[#allocation7 + $0x30] sm:$0xff]  }
  0x3c   :  { %323 = vmatprep.subr.bf16.mxu0 %v442_v1  ;;  %331 = vmatprep.subr.bf16.mxu1 %v442_v1  ;;  %v366_v13 = vld [vmem:[#allocation7 + $0x38] sm:$0xff]   ;;  %v293_v14 = vld [vmem:[%s556_s2] ss:$0 sm:$0xff] }
  0x3d   :  { %v298_v24 = vld [vmem:[%s558_s4] ss:$0 sm:$0xff] }
  0x3e   :  { %v307_v29 = vld [vmem:[%s559_s5] ss:$0 sm:$0xff] }
  0x3f   :  { %324 = vmatpush3.bf16.msra.mxu0 %v102_v4  ;;  %332 = vmatpush3.bf16.msra.mxu1 %v360_v7  ;;  %v308_v36 = vld [vmem:[#allocation2] ss:$0 sm:$0xff] }
  0x40   :  { %333 = vmatprep.subr.bf16.mxu1 %v442_v1 }
  0x42   :  { %326 = vmatmul.mubr.msk.bf16.vlgmr.msra.gmra.mrb[0].mxu0 %vm96_vm2, %v358_v6 }
  0x43   :  { %334 = vmatpush3.bf16.msra.mxu1 %v361_v8 }
  0x44   :  { %335 = vmatprep.subr.bf16.mxu1 %v442_v1 }
  0x47   :  { %336 = vmatpush3.bf16.msra.mxu1 %v362_v9 }
  0x48   :  { %337 = vmatprep.subr.bf16.mxu1 %v442_v1 }
  0x4b   :  { %338 = vmatpush3.bf16.msra.mxu1 %v363_v10 }
  0x4c   :  { %339 = vmatprep.subr.bf16.mxu1 %v442_v1 }
  0x4f   :  { %340 = vmatpush3.bf16.msra.mxu1 %v364_v11 }
  0x50   :  { %341 = vmatprep.subr.bf16.mxu1 %v442_v1 }
  0x53   :  { %342 = vmatpush3.bf16.msra.mxu1 %v365_v12 }
  0x54   :  { %343 = vmatprep.subr.bf16.mxu1 %v442_v1 }
  0x57   :  { %344 = vmatpush3.bf16.msra.mxu1 %v366_v13 }
 0x115   :  { %v138_v15 = vpop.f32.mrb[0].mxu0 }
 0x116   :  { %v139_v16 = vadd.f32 %v293_v14, %v138_v15  ;;  %v327_v17 = vpop.f32.mrb[1].mxu0 }
 0x117   :  { %v141_v18 = vpop.f32.mrb[2].mxu0 }
 0x118   :  { %v142_v19 = vadd.f32 %v293_v14, %v141_v18  ;;  %v328_v20 = vpop.f32.mrb[3].mxu0  ;;  %v145_v21 = vmax.f32 %v139_v16, 0.0 }
 0x11a   :  { %v146_v22 = vmax.f32 %v142_v19, 0.0 }
 0x11c   :  { %v147_v23 = vpack.c.bf16 %v146_v22, %v145_v21 }
 0x11e   :  { %346 = vmatmul.mubr.bf16.vlgmr.msra.gmra.mrb[0].mxu1 %v147_v23 }
 0x1f1   :  { %v253_v25 = vpop.f32.mrb[0].mxu1 }
 0x1f2   :  { %v254_v26 = vadd.f32 %v298_v24, %v253_v25  ;;  %v347_v27 = vpop.f32.mrb[1].mxu1 }
 0x1f3   :  { %v256_v28 = vpop.f32.mrb[2].mxu1 }
 0x1f4   :  { %v260_v30 = vmax.f32 %v254_v26, 0.0  ;;  %v257_v31 = vadd.f32 %v298_v24, %v256_v28  ;;  %v348_v32 = vpop.f32.mrb[3].mxu1 }
 0x1f6   :  { %v261_v33 = vmax.f32 %v257_v31, 0.0  ;;  %v269_v34 = vmul.f32 %v307_v29, %v260_v30 }
 0x1f8   :  { %271 = vadd.xlane.f32.xlu0 %v269_v34  ;;  %v270_v35 = vmul.f32 %v307_v29, %v261_v33 }
 0x1fc   :  { %273 = vadd.xlane.f32.xlu0 %v270_v35 }
 0x285   :  { %v272_v37 = vpop.xlane.xlu0 %271 }
 0x286   :  { %v282_v38 = vadd.f32 %v308_v36, %v272_v37 }
 0x288   :  { %285 = vst.msk [vmem:[%s561_s7] sm:$0xff] %vm284_vm3, %v282_v38 }
 0x289   :  { %v274_v39 = vpop.xlane.xlu0 %273 }
 0x28a   :  { %v283_v40 = vadd.f32 %v308_v36, %v274_v39 }
 0x28c   :  { %286 = vst.msk [vmem:[%s561_s7 + $0x8] sm:$0xff] %vm284_vm3, %v283_v40 }
 0x28d   :  { %291 = vsyncpa [#allocation4], 1 }
 0x28e   :  { %292 = vsyncpa [#allocation6], 1 }

</bundles_post_ra>
